<compile_context>
chip_gen: v6e
topology: v6e:2x2x1
jax: 0.10.0
libtpu: 0.0.40
codegen_flags: <defaults>
</compile_context>

<pallas_src>
import jax
import jax.numpy as jnp
import numpy as np
from jax import lax
from jax.experimental import pallas as pl
from jax.experimental.pallas import tpu as pltpu


FILTER_1D = (1.0, 3.0, 3.0, 1.0)   # from Upsample.__init__ (deterministic buffer)
STRIDE = 2


def _phase_weights():
    # 1-D transposed-conv taps per output parity: even outputs hit taps (0, 2),
    # odd outputs hit taps (1, 3) of f = arr / sum(arr) * stride.
    s = float(sum(FILTER_1D))
    f = [v / s * STRIDE for v in FILTER_1D]          # [0.125, 0.375, 0.375, 0.125]
    return (f[0], f[2]), (f[1], f[3])                 # (e0, e1), (o0, o1)


def _row_matrix(h):
    """(2h, h) matrix: 2-tap row filter + 2x row interleave + reflection baked in."""
    (e0, e1), (o0, o1) = _phase_weights()
    a = np.zeros((2 * h, h), dtype=np.float32)
    for q in range(h):
        a[2 * q, q] += e1
        a[2 * q, q - 1 if q >= 1 else 1] += e0                      # reflect -1 -> 1
        a[2 * q + 1, q] += o0
        a[2 * q + 1, q + 1 if q + 1 <= h - 1 else h - 2] += o1      # reflect h -> h-2
    return a   # entries are 0 / 0.125 / 0.375: all exactly representable in bf16


def _dot_exact(lhs, rhs, data_on_left):
    """f32-exact `data @ const` (or `const @ data`) on the MXU.

    The constant operand only holds 0 / 0.125 / 0.375 (bf16-exact), so splitting
    the f32 data operand into three bf16-magnitude chunks keeps the result
    accurate to ~f32 regardless of how the backend implements f32 matmuls.
    The MXU is otherwise idle in this HBM-bound kernel, so extra passes are free.
    """
    data = lhs if data_on_left else rhs
    hi = data.astype(jnp.bfloat16).astype(jnp.float32)
    rest = data - hi
    mid = rest.astype(jnp.bfloat16).astype(jnp.float32)
    lo = rest - mid
    out = None
    for chunk in (hi, mid, lo):
        term = (jnp.dot(chunk, rhs, preferred_element_type=jnp.float32)
                if data_on_left
                else jnp.dot(lhs, chunk, preferred_element_type=jnp.float32))
        out = term if out is None else out + term
    return out


def _upsample_kernel(a_ref, m_ref, x_ref, o_ref):
    A = a_ref[...]            # (2H, H)  loop-invariant, hoisted out of the loop
    M = m_ref[...]            # (W, 2W)  loop-invariant

    def body(b, carry):
        # Per-plane processing keeps the live set tiny (no vreg spills as TB grows).
        x = x_ref[b].astype(jnp.float32)              # (H, W); upcast low-precision inputs
        u = _dot_exact(x, M, data_on_left=True)       # (H, 2W)  col filter + interleave
        y = _dot_exact(A, u, data_on_left=False)      # (2H, 2W) row filter + interleave
        o_ref[b] = y.astype(o_ref.dtype)              # dense, fully interleaved store
        return carry

    lax.fori_loop(0, x_ref.shape[0], body, 0)


def _pick_block_planes(nc, h, w):
    # Double-buffered VMEM per grid step ~= 2 * (1 input + 4 output) * H*W * 4B / plane.
    # Stay under the smallest scoped-VMEM defaults (v5e 16 MiB, v7x 32 MiB of 64 MiB
    # physical) and keep >= 2 grid steps so v7x's two TensorCores both get work.
    bytes_per_plane = 2 * 5 * h * w * 4
    budget = 12 * 1024 * 1024
    cap = max(1, budget // bytes_per_plane)
    return int(max(1, min(cap, (nc + 1) // 2, nc)))


def upsample(x, *, block_planes=None):
    N, C, H, W = x.shape
    if H < 2 or W < 2:
        raise ValueError("Upsample (ReflectionPad2d(1)) requires H >= 2 and W >= 2")
    nc = N * C
    tb = _pick_block_planes(nc, H, W) if block_planes is None else int(block_planes)
    nc_pad = ((nc + tb - 1) // tb) * tb

    A = jnp.asarray(_row_matrix(H))            # (2H, H)
    Mt = jnp.asarray(_row_matrix(W).T)         # (W, 2W)

    xf = x.reshape(nc, H, W)
    if nc_pad != nc:
        xf = jnp.concatenate(
            [xf, jnp.zeros((nc_pad - nc, H, W), dtype=x.dtype)], axis=0)

    out = pl.pallas_call(
        _upsample_kernel,
        out_shape=jax.ShapeDtypeStruct((nc_pad, 2 * H, 2 * W), x.dtype),
        grid=(nc_pad // tb,),
        in_specs=[
            pl.BlockSpec((2 * H, H), lambda i: (0, 0)),
            pl.BlockSpec((W, 2 * W), lambda i: (0, 0)),
            pl.BlockSpec((tb, H, W), lambda i: (i, 0, 0)),
        ],
        out_specs=pl.BlockSpec((tb, 2 * H, 2 * W), lambda i: (i, 0, 0)),
        compiler_params=pltpu.CompilerParams(
            dimension_semantics=("parallel",),
            vmem_limit_bytes=32 * 1024 * 1024,
        ),
    )(A, Mt, xf)

    # Pure metadata reshape (plus a no-op slice when nc_pad == nc): the output in
    # HBM is already the interleaved NCHW result.
    return out[:nc].reshape(N, C, 2 * H, 2 * W)


def upsample_reference(x):
    """Pure-JAX replica of the PyTorch forward (validation only, not the kernel)."""
    N, C, H, W = x.shape
    arr = jnp.asarray(FILTER_1D, dtype=x.dtype)
    filt2d = arr[:, None] * arr[None, :]
    filt2d = filt2d / jnp.sum(filt2d) * (STRIDE ** 2)
    w = jnp.tile(filt2d[None, None], (C, 1, 1, 1))                 # (C, 1, 4, 4) depthwise
    xp = jnp.pad(x, ((0, 0), (0, 0), (1, 1), (1, 1)), mode="reflect")
    # conv_transpose2d(stride=2, padding=2) == lhs-dilated conv, pad k-1-p=1,
    # flipped (symmetric) kernel.
    y = lax.conv_general_dilated(
        xp, w, window_strides=(1, 1), padding=((1, 1), (1, 1)),
        lhs_dilation=(STRIDE, STRIDE), rhs_dilation=(1, 1),
        dimension_numbers=("NCHW", "OIHW", "NCHW"), feature_group_count=C,
        precision=lax.Precision.HIGHEST)
    return y[:, :, 1:-1, 1:-1]    # [:, :, 1:, 1:] then (filter even) [:, :, :-1, :-1]


if __name__ == "__main__":
    key = jax.random.PRNGKey(0)
    N, C, H, W = 2, 4, 16, 16
    x = jax.random.normal(key, (N, C, H, W), dtype=jnp.float32)

    y = upsample(x)
    jax.block_until_ready(y)

    y_ref = upsample_reference(x)
    assert y.shape == (N, C, 2 * H, 2 * W), y.shape
    max_err = float(jnp.max(jnp.abs(y - y_ref)))
    assert jnp.allclose(y, y_ref, atol=1e-5, rtol=1e-5), max_err
    print("KERNEL_OK")
</pallas_src>

<mosaic_0001>
module attributes {stable_mosaic.version = 11 : i64} {
  func.func @_upsample_kernel(%arg0: i32, %arg1: memref<32x16xf32, #tpu.memory_space<vmem>>, %arg2: memref<16x32xf32, #tpu.memory_space<vmem>>, %arg3: memref<4x16x16xf32, #tpu.memory_space<vmem>>, %arg4: memref<4x32x32xf32, #tpu.memory_space<vmem>>) attributes {dimension_semantics = [#tpu.dimension_semantics<parallel>], iteration_bounds = array<i64: 2>, scalar_prefetch = 0 : i64, scratch_operands = 0 : i64, tpu.core_type = #tpu.core_type<tc>, window_params = [{pipeline_mode = #tpu.pipeline_mode<synchronous>, transform_indices = @transform_0, window_bounds = array<i64: 32, 16>}, {pipeline_mode = #tpu.pipeline_mode<synchronous>, transform_indices = @transform_1, window_bounds = array<i64: 16, 32>}, {transform_indices = @transform_2, window_bounds = array<i64: 4, 16, 16>}, {transform_indices = @transform_3, window_bounds = array<i64: 4, 32, 32>}]} {
    %c0 = arith.constant 0 : index
    %c0_0 = arith.constant 0 : index
    %0 = vector.load %arg1[%c0, %c0_0] : memref<32x16xf32, #tpu.memory_space<vmem>>, vector<32x16xf32>
    %c0_1 = arith.constant 0 : index
    %c0_2 = arith.constant 0 : index
    %1 = vector.load %arg2[%c0_1, %c0_2] : memref<16x32xf32, #tpu.memory_space<vmem>>, vector<16x32xf32>
    %c0_i32 = arith.constant 0 : i32
    %c4_i32 = arith.constant 4 : i32
    %2 = arith.addi %c0_i32, %c4_i32 : i32
    %c1_i32 = arith.constant 1 : i32
    scf.for %arg5 = %c0_i32 to %2 step %c1_i32  : i32 {
      %3 = arith.index_cast %arg5 : i32 to index
      %c0_4 = arith.constant 0 : index
      %c0_5 = arith.constant 0 : index
      %4 = vector.load %arg3[%3, %c0_4, %c0_5] : memref<4x16x16xf32, #tpu.memory_space<vmem>>, vector<1x16x16xf32>
      %5 = vector.shape_cast %4 : vector<1x16x16xf32> to vector<16x16xf32>
      %6 = arith.truncf %5 : vector<16x16xf32> to vector<16x16xbf16>
      %7 = arith.extf %6 : vector<16x16xbf16> to vector<16x16xf32>
      %8 = arith.subf %5, %7 : vector<16x16xf32>
      %9 = arith.truncf %8 : vector<16x16xf32> to vector<16x16xbf16>
      %10 = arith.extf %9 : vector<16x16xbf16> to vector<16x16xf32>
      %11 = arith.subf %8, %10 : vector<16x16xf32>
      %cst = arith.constant dense<0.000000e+00> : vector<16x32xf32>
      %12 = tpu.matmul %7, %1, %cst {dimension_numbers = #tpu.dot_dimension_numbers<[1], [0], [0], [1], [0, 0, 1, 1], [], []>} : vector<16x16xf32>, vector<16x32xf32>, vector<16x32xf32> -> vector<16x32xf32>
      %cst_6 = arith.constant dense<0.000000e+00> : vector<16x32xf32>
      %13 = tpu.matmul %10, %1, %cst_6 {dimension_numbers = #tpu.dot_dimension_numbers<[1], [0], [0], [1], [0, 0, 1, 1], [], []>} : vector<16x16xf32>, vector<16x32xf32>, vector<16x32xf32> -> vector<16x32xf32>
      %14 = arith.addf %12, %13 : vector<16x32xf32>
      %cst_7 = arith.constant dense<0.000000e+00> : vector<16x32xf32>
      %15 = tpu.matmul %11, %1, %cst_7 {dimension_numbers = #tpu.dot_dimension_numbers<[1], [0], [0], [1], [0, 0, 1, 1], [], []>} : vector<16x16xf32>, vector<16x32xf32>, vector<16x32xf32> -> vector<16x32xf32>
      %16 = arith.addf %14, %15 : vector<16x32xf32>
      %17 = arith.truncf %16 : vector<16x32xf32> to vector<16x32xbf16>
      %18 = arith.extf %17 : vector<16x32xbf16> to vector<16x32xf32>
      %19 = arith.subf %16, %18 : vector<16x32xf32>
      %20 = arith.truncf %19 : vector<16x32xf32> to vector<16x32xbf16>
      %21 = arith.extf %20 : vector<16x32xbf16> to vector<16x32xf32>
      %22 = arith.subf %19, %21 : vector<16x32xf32>
      %cst_8 = arith.constant dense<0.000000e+00> : vector<32x32xf32>
      %23 = tpu.matmul %0, %18, %cst_8 {dimension_numbers = #tpu.dot_dimension_numbers<[1], [0], [0], [1], [0, 0, 1, 1], [], []>} : vector<32x16xf32>, vector<16x32xf32>, vector<32x32xf32> -> vector<32x32xf32>
      %cst_9 = arith.constant dense<0.000000e+00> : vector<32x32xf32>
      %24 = tpu.matmul %0, %21, %cst_9 {dimension_numbers = #tpu.dot_dimension_numbers<[1], [0], [0], [1], [0, 0, 1, 1], [], []>} : vector<32x16xf32>, vector<16x32xf32>, vector<32x32xf32> -> vector<32x32xf32>
      %25 = arith.addf %23, %24 : vector<32x32xf32>
      %cst_10 = arith.constant dense<0.000000e+00> : vector<32x32xf32>
      %26 = tpu.matmul %0, %22, %cst_10 {dimension_numbers = #tpu.dot_dimension_numbers<[1], [0], [0], [1], [0, 0, 1, 1], [], []>} : vector<32x16xf32>, vector<16x32xf32>, vector<32x32xf32> -> vector<32x32xf32>
      %27 = arith.addf %25, %26 : vector<32x32xf32>
      %28 = arith.index_cast %arg5 : i32 to index
      %c0_11 = arith.constant 0 : index
      %c0_12 = arith.constant 0 : index
      %29 = vector.load %arg4[%28, %c0_11, %c0_12] : memref<4x32x32xf32, #tpu.memory_space<vmem>>, vector<1x32x32xf32>
      %30 = vector.shape_cast %29 : vector<1x32x32xf32> to vector<32x32xf32>
      %31 = vector.shape_cast %27 : vector<32x32xf32> to vector<1x32x32xf32>
      tpu.vector_store %arg4[%28, %c0_11, %c0_12], %31 {strides = array<i32>} : memref<4x32x32xf32, #tpu.memory_space<vmem>>, vector<1x32x32xf32>,
    }
    %c4_i32_3 = arith.constant 4 : i32
    return
  }
  func.func @transform_0(%arg0: i32) -> (i32, i32) {
    %c0_i32 = arith.constant 0 : i32
    %c0_i32_0 = arith.constant 0 : i32
    %c0_i32_1 = arith.constant 0 : i32
    return %c0_i32, %c0_i32_0 : i32, i32
  }
  func.func @transform_1(%arg0: i32) -> (i32, i32) {
    %c0_i32 = arith.constant 0 : i32
    %c0_i32_0 = arith.constant 0 : i32
    %c0_i32_1 = arith.constant 0 : i32
    return %c0_i32, %c0_i32_0 : i32, i32
  }
  func.func @transform_2(%arg0: i32) -> (i32, i32, i32) {
    %c0_i32 = arith.constant 0 : i32
    %c0_i32_0 = arith.constant 0 : i32
    %c0_i32_1 = arith.constant 0 : i32
    return %arg0, %c0_i32, %c0_i32_0 : i32, i32, i32
  }
  func.func @transform_3(%arg0: i32) -> (i32, i32, i32) {
    %c0_i32 = arith.constant 0 : i32
    %c0_i32_0 = arith.constant 0 : i32
    %c0_i32_1 = arith.constant 0 : i32
    return %arg0, %c0_i32, %c0_i32_0 : i32, i32, i32
  }
}

</mosaic_0001>

<bundles_post_ra>
// kernel: tpu_custom_call.1
= control target key start
LH: loop header
LB: loop body
LE: loop exit
PB: predicated region body
PF: predicated region fallthrough
CT: control target
= control target key end

     0   :  { %8 = vsyncpa [#allocation3], 0  ;;  %s1400_s0 = inlined_call_operand.vmem [shape: f32[32,16], index: 0, kind: input, shape index: {}]   ;;  %s1401_s1 = inlined_call_operand.vmem [shape: f32[16,32], index: 1, kind: input, shape index: {}]   ;;  %s1402_s2 = inlined_call_operand.hbm [shape: f32[8,16,16], index: 2, kind: input, shape index: {}]   ;;  %s1403_s3 = inlined_call_operand.hbm [shape: f32[8,32,32], index: 3, kind: output, shape index: {}]  }
   0x1   :  { %10 = vsyncpa [#allocation3 + $0x1], 0 }
   0x2   :  { %11 = vsyncpa [#allocation4], 0 }
   0x3   :  { %13 = vsyncpa [#allocation4 + $0x1], 0  ;;  %s1156_s12 = smov 0   ;;  %s1158_s13 = smov 0  }
   0x4   :  { %s1160_s14 = smov 0   ;;  %s1162_s15 = smov 0  }
   0x5 LB: > { %s1177_s16 = sadd.s32 4294967295, %s1124_s15   ;;  %s849_s17 = sadd.s32 4294967294, %s1124_s15   ;;  %s1124_s15 = sphi %s1162_s15, %s1418_s15   ;;  %s1120_s14 = sphi %s1160_s14, %s1417_s14   ;;  %s1116_s13 = sphi %s1158_s13, %s1416_s13   ;;  %s1112_s12 = sphi %s1156_s12, %s1415_s12  }
   0x6   : > { %s1181_s18 = sadd.s32 1, %s1124_s15   ;;  %s68_s19 = sadd.s32 1, %s1120_s14 }
   0x7   : > { %s65_s20 = ssub.s32 %s1124_s15, %s1181_s18  ;;  %p75_p0 = scmp.ne.s32.totalorder %s1120_s14, %s1116_s13 }
   0x8   : > { %p66_p1 = scmp.eq.s32.totalorder %s65_s20, 0  ;;  %p76_p2 = scmp.eq.s32.totalorder %s1124_s15, 0 }
   0x9   : > { %p81_p3 = scmp.ne.s32.totalorder %s1116_s13, %s1112_s12  ;;  %p82_p4 = scmp.eq.s32.totalorder %s1177_s16, 0 }
   0xa   : > { %s1193_s21 = scalar_select %p66_p1, %s1120_s14, %s68_s19  }
   0xb   : > { %p1195_p5 = por %p76_p2, %p75_p0  ;;  %p1199_p6 = por %p82_p4, %p81_p3 }
   0xc   : > { %p105_p7 = scmp.eq.s32.totalorder %s1177_s16, 1  ;;  %p111_p8 = scmp.eq.s32.totalorder %s849_s17, 1 }
   0xd   : > { %s1407_s23 = scalar_select %p1199_p6, 1, 0 }
   0xe   : > { %p982_p10 = scmp.lt.s32.totalorder %s1124_s15, 2  ;;  %p1206_p11 = por %p105_p7, %p75_p0 }
   0xf   : > { %p1210_p12 = por %p111_p8, %p81_p3  ;;  %s137_s26 = sand.u32 1, %s1120_s14  }
  0x10   : > { %s1408_s24 = scalar_select %p1206_p11, 1, 0 }
  0x11   : > { %s1409_s25 = scalar_select %p1210_p12, 1, 0 }
  0x12   : > { %s886_s27 = sshll.u32 %s1124_s15, 10  ;;  %s852_s28 = sshll.u32 %s137_s26, 6 }
  0x13   : > { %s1219_s4 = scalar_lea.hbm %s1402_s2, %s886_s27  ;;  %s141_s5 = scalar_lea.vmem [#allocation2], %s852_s28 }
  0x14   : > { %s149_s6 = sshll.u32 %s141_s5, 4  ;;  %p1223_p13 = pnand %p982_p10, %p1195_p5  ;;  %s1227_s6 = int_to_ptr.vmem [resolvable:$true] %s149_s6 }
  0x15   : > { %s1229_s8 = scalar_lea.sflag [#allocation3], %s137_s26  ;;  %s1028_s9 = scalar_lea.hbm %s1219_s4, 1024 }
  0x16   : > { %p1029_p0 = scmp.ne.s32.totalorder %s1219_s4, %s1028_s9  ;;  %p1030_p1 = pneg %p1223_p13 }
  0x17   : > { %s1033_s17 = scalar_lea.hbm %s1402_s2, 2048  ;;  %p1034_p4 = scmp.lt.s32.totalorder %s1219_s4, %s1402_s2 }
  0x18   : > { %p1031_p2 = pnand %p1030_p1, %p1029_p0  ;;  %p1035_p5 = scmp.lt.s32.totalorder %s1033_s17, %s1028_s9 }
  0x1a   : > { %p1032_p3 = pneg %p1031_p2  ;;  %p1036_p7 = por %p1035_p5, %p1034_p4 }
  0x1c   : > { %p1037_p8 = pnand %p1036_p7, %p1032_p3 }
  0x1e   : > { %1040 = shalt.err (!%p1037_p8)
}
  0x1f   : > { %s1041_s22 = scalar_lea.vmem %s1227_s6, 1024  ;;  %s1130_s26 = smov [#allocation2]  }
  0x20   : > { %p1042_p10 = scmp.ne.s32.totalorder %s1227_s6, %s1041_s22  ;;  %s1046_s27 = sshll.u32 %s1130_s26, 4  ;;  %s1047_s27 = int_to_ptr.vmem [resolvable:$false] %s1046_s27 }
  0x21   : > { %s1048_s28 = scalar_lea.vmem %s1047_s27, 2048  ;;  %p1049_p2 = scmp.lt.s32.totalorder %s1227_s6, %s1047_s27 }
  0x22   : > { %p1044_p9 = pnand %p1042_p10, %p1030_p1  ;;  %p1050_p12 = scmp.lt.s32.totalorder %s1048_s28, %s1041_s22 }
  0x24   : > { %p1045_p0 = pneg %p1044_p9  ;;  %p1051_p11 = por %p1050_p12, %p1049_p2 }
  0x26   : > { %p1052_p6 = pnand %p1051_p11, %p1045_p0 }
  0x28   : > { %1055 = shalt.err (!%p1052_p6)
}
  0x29   : > { %s1131_s29 = smov 128   ;;  %s1132_s30 = smov 8  }
  0x2a   : > { %977 = dma.hbm_to_vmem [thread:$0]  (!%p1223_p13), %s1219_s4, 1024, %s1227_s6, %s1229_s8, %s1131_s29, %s1131_s29, %s1132_s30  }
  0x2b   : > { %p856_p9 = scmp.ge.s32.totalorder %s1124_s15, 1  ;;  %p157_p1 = scmp.lt.s32.totalorder %s1124_s15, 3 }
  0x2d   : > { %p158_p3 = pnand %p856_p9, %p157_p1 }
  0x2e   : > { %s1253_s5 = sand.u32 (!%p158_p3), 1, %s1116_s13   ;;  %p1411_p6 = scmp.ne.s32.totalorder (!%p158_p3), %s1407_s23, 0 }
  0x2f   : > { %161 = sbr.rel (%p158_p3) target bundleno = 508 (0x1fc), region = 32  ;;  %s857_s9 = sshll.u32 (!%p158_p3), %s1253_s5, 6 }
  0x30   : > { %s164_s10 = scalar_lea.sflag (!%p158_p3), [#allocation3], %s1253_s5  ;;  %s1257_s11 = scalar_lea.vmem (!%p158_p3), [#allocation2], %s857_s9 }
  0x34   : > { %1103 = dma.done.wait (%p1411_p6), %s164_s10, 1024  }
  0x35   : > { %1105 = vsyncadd (%p1411_p6), %s164_s10, 4294966272  ;;  %s858_s4 = sshll.u32 %s1253_s5, 7  ;;  %v1267_v0 = vld [vmem:[%s1400_s0] sm:$0xff]  ;;  %v1272_v1 = vld [vmem:[%s1400_s0 + $0x8] sm:$0xff]  ;;  %s1296_s9 = smov 0  }
  0x36   : > { %v1277_v2 = vld [vmem:[%s1400_s0 + $0x10] sm:$0xff]  ;;  %v1282_v3 = vld [vmem:[%s1400_s0 + $0x18] sm:$0xff]  ;;  %v1287_v4 = vld [vmem:[%s1401_s1] sm:$0xff]  ;;  %s1294_s30 = scalar_lea.vmem [#allocation5], %s858_s4 }
  0x37   : > { %v1292_v5 = vld [vmem:[%s1401_s1 + $0x8] sm:$0xff] }
  0x38 LB: >> { %919 = vmatprep.subr.mxu0 %v1292_v5  ;;  %926 = vmatprep.subr.mxu1 %v1292_v5  ;;  %s859_s10 = sshll.u32 %s1128_s9, 4  ;;  %vm218_vm0 = vcmask 130048   ;;  %s878_s6 = sshll.u32 %s1128_s9, 5  ;;  %vm747_vm1 = vcmask 261120   ;;  %s1128_s9 = sphi %s1296_s9, %s203_s9  }
  0x39   : >> { %920 = vmatpush3.msra.mxu0 %v1292_v5  ;;  %927 = vmatpush3.msra.mxu1 %v1292_v5  ;;  %s205_s4 = scalar_lea.vmem %s1257_s11, %s859_s10 [#allocation2]  ;;  %s746_s7 = scalar_lea.vmem %s1294_s30, %s878_s6 [#allocation5] }
  0x3a   : >> { %921 = vmatprep.subr.mxu0 %v1287_v4  ;;  %928 = vmatprep.subr.mxu1 %v1287_v4  ;;  %v206_v6 = vld [vmem:[%s205_s4] sm:$0xff]  ;;  %v207_v7 = vld [vmem:[%s205_s4 + $0x8] sm:$0xff]  ;;  %s203_s9 = sadd.s32 1, %s1128_s9  }
  0x3b   : >> { %922 = vmatpush3.msra.mxu0 %v1287_v4  ;;  %929 = vmatpush3.msra.mxu1 %v1287_v4  ;;  %v208_v8 = vpack.c.bf16 %v207_v7, %v206_v6  ;;  %p200_p11 = scmp.ge.s32.totalorder %s203_s9, 4  }
  0x3c   : >> { %933 = vmatprep.subr.mxu0 %v1292_v5  ;;  %s888_s8 = sshll.u32 (%p200_p11), %s1177_s16, 11  ;;  %s767_s22 = sshll.u32 (%p200_p11), %s1294_s30, 4  ;;  %s1357_s22 = int_to_ptr.vmem [resolvable:$true] %s767_s22 }
  0x3d   : >> { %v209_v9 = vunpack.c.l.bf16 %v208_v8  ;;  %v210_v10 = vunpack.c.h.bf16 %v208_v8  ;;  %s1354_s20 = scalar_lea.hbm (%p200_p11), %s1403_s3, %s888_s8  ;;  %s753_s23 = scalar_lea.sflag (%p200_p11), [#allocation4], %s1253_s5 }
  0x3e   : > { %s1056_s26 = scalar_lea.vmem (%p200_p11), %s1357_s22, 2048  ;;  %p1412_p13 = scmp.ne.s32.totalorder (%p200_p11), %s1408_s24, 0 }
  0x3f   : >> { %v211_v11 = vsub.f32 %v206_v6, %v209_v9  ;;  %v212_v12 = vsub.f32 %v207_v7, %v210_v10  ;;  %930 = vmatprep.mubr.msk.f32.mxu1 %vm218_vm0, %v209_v9  ;;  %p1057_p12 = scmp.ne.s32.totalorder (%p200_p11), %s1357_s22, %s1056_s26  ;;  %s1133_s11 = smov (%p200_p11), [#allocation5]  }
  0x40   : >> { %931 = vmatmul.mubr.msk.f32.vlgmr.msra.gmra.mxu1 %vm218_vm0, %v210_v10  ;;  %s1060_s27 = sshll.u32 (%p200_p11), %s1133_s11, 4  ;;  %s1061_s27 = int_to_ptr.vmem [resolvable:$false] %s1060_s27 }
  0x41   : >> { %v213_v13 = vpack.c.bf16 %v212_v12, %v211_v11  ;;  %944 = vmatprep.mubr.msk.f32.mxu1 %vm218_vm0, %v1267_v0  ;;  %p1058_p4 = pnand (%p200_p11), %p1057_p12, %p1412_p13  ;;  %s1062_s16 = scalar_lea.vmem (%p200_p11), %s1061_s27, 4096 }
  0x42   : > { %p1063_p7 = scmp.lt.s32.totalorder (%p200_p11), %s1357_s22, %s1061_s27  ;;  %p1064_p8 = scmp.lt.s32.totalorder (%p200_p11), %s1062_s16, %s1056_s26 }
  0x43   : >> { %v214_v14 = vunpack.c.l.bf16 %v213_v13  ;;  %v215_v15 = vunpack.c.h.bf16 %v213_v13  ;;  %p1059_p5 = pneg (%p200_p11), %p1058_p4 }
  0x44   : > { %p1065_p10 = por (%p200_p11), %p1064_p8, %p1063_p7 }
  0x45   : >> { %v216_v16 = vsub.f32 %v211_v11, %v214_v14  ;;  %923 = vmatprep.mubr.msk.f32.mxu0 %vm218_vm0, %v214_v14  ;;  %v217_v17 = vsub.f32 %v212_v12, %v215_v15 }
  0x46   : >> { %924 = vmatmul.mubr.msk.f32.vlgmr.msra.gmra.mxu0 %vm218_vm0, %v215_v15  ;;  %p1066_p0 = pnand (%p200_p11), %p1065_p10, %p1059_p5 }
  0x47   : >> { %934 = vmatpush3.msra.mxu0 %v1292_v5  ;;  %937 = vmatprep.mubr.msk.f32.mxu0 %vm218_vm0, %v216_v16 }
  0x48   : >> { %935 = vmatprep.subr.mxu0 %v1287_v4 }
  0x49   : >> { %936 = vmatpush3.msra.mxu0 %v1287_v4 }
  0x4a   : >> { %938 = vmatmul.mubr.msk.f32.vlgmr.msra.gmra.mxu0 %vm218_vm0, %v217_v17 }
  0x4b   : >> { %954 = vmatprep.mubr.msk.f32.mxu0 %vm218_vm0, %v1267_v0 }
 0x100   : >> { %v932_v18 = vpop.f32.mrf.mxu1 }
 0x102   : >> { %v372_v21 = vpop.f32.mrf.mxu1 }
 0x106   : >> { %v925_v19 = vpop.f32.mrf.mxu0 }
 0x107   : >> { %v378_v23 = vadd.f32 %v932_v18, %v925_v19 }
 0x108   : >> { %v291_v20 = vpop.f32.mrf.mxu0 }
 0x109   : >> { %v373_v24 = vadd.f32 %v372_v21, %v291_v20 }
 0x10a   : >> { %v939_v22 = vpop.f32.mrf.mxu0 }
 0x10b   : >> { %v463_v26 = vadd.f32 %v939_v22, %v378_v23 }
 0x10c   : >> { %v453_v25 = vpop.f32.mrf.mxu0 }
 0x10d   : >> { %v462_v27 = vadd.f32 %v453_v25, %v373_v24 }
 0x10f   : >> { %v464_v28 = vpack.c.bf16 %v463_v26, %v462_v27 }
 0x111   : >> { %v465_v29 = vunpack.c.l.bf16 %v464_v28  ;;  %v466_v30 = vunpack.c.h.bf16 %v464_v28 }
 0x113   : >> { %v467_v31 = vsub.f32 %v462_v27, %v465_v29  ;;  %950 = vmatprep.subr.mxu0 %v466_v30  ;;  %v468_v32 = vsub.f32 %v463_v26, %v466_v30 }
 0x114   : >> { %951 = vmatpush3.msra.mxu0 %v466_v30 }
 0x115   : >> { %952 = vmatprep.subr.mxu0 %v465_v29  ;;  %v469_v33 = vpack.c.bf16 %v468_v32, %v467_v31 }
 0x116   : >> { %953 = vmatpush3.msra.mxu0 %v465_v29 }
 0x117   : >> { %v471_v34 = vunpack.c.h.bf16 %v469_v33  ;;  %955 = vmatmul.mubr.msk.f32.vlgmr.msra.gmra.mxu0 %vm218_vm0, %v1272_v1  ;;  %v470_v35 = vunpack.c.l.bf16 %v469_v33 }
 0x118   : >> { %957 = vmatprep.mubr.msk.f32.mxu0 %vm218_vm0, %v1277_v2 }
 0x119   : >> { %940 = vmatprep.subr.mxu1 %v471_v34  ;;  %v473_v36 = vsub.f32 %v468_v32, %v471_v34  ;;  %v472_v37 = vsub.f32 %v467_v31, %v470_v35 }
 0x11a   : >> { %941 = vmatpush3.msra.mxu1 %v471_v34 }
 0x11b   : >> { %942 = vmatprep.subr.mxu1 %v470_v35  ;;  %958 = vmatmul.mubr.msk.f32.gmra.mxu0 %vm218_vm0, %v1282_v3 }
 0x11c   : >> { %943 = vmatpush3.msra.mxu1 %v470_v35 }
 0x11d   : >> { %945 = vmatmul.mubr.msk.f32.vlgmr.msra.gmra.mxu1 %vm218_vm0, %v1272_v1  ;;  %960 = vmatprep.subr.mxu1 %v473_v36 }
 0x11e   : >> { %961 = vmatpush3.msra.mxu1 %v473_v36  ;;  %947 = vmatprep.mubr.msk.f32.mxu1 %vm218_vm0, %v1277_v2 }
 0x11f   : >> { %962 = vmatprep.subr.mxu1 %v472_v37 }
 0x120   : >> { %963 = vmatpush3.msra.mxu1 %v472_v37 }
 0x121   : >> { %948 = vmatmul.mubr.msk.f32.gmra.mxu1 %vm218_vm0, %v1282_v3 }
 0x122   : >> { %964 = vmatprep.mubr.msk.f32.mxu1 %vm218_vm0, %v1267_v0 }
 0x125   : >> { %965 = vmatmul.mubr.msk.f32.vlgmr.msra.gmra.mxu1 %vm218_vm0, %v1272_v1 }
 0x126   : >> { %967 = vmatprep.mubr.msk.f32.mxu1 %vm218_vm0, %v1277_v2 }
 0x129   : >> { %968 = vmatmul.mubr.msk.f32.gmra.mxu1 %vm218_vm0, %v1282_v3 }
 0x1d7   : >> { %v956_v38 = vpop.f32.mrf.mxu0 }
 0x1d9   : >> { %v637_v41 = vpop.f32.mrf.mxu0 }
 0x1db   : >> { %v959_v43 = vpop.f32.mrf.mxu0 }
 0x1dd   : >> { %v946_v39 = vpop.f32.mrf.mxu1  ;;  %v647_v49 = vpop.f32.mrf.mxu0 }
 0x1de   : >> { %v643_v45 = vadd.f32 %v956_v38, %v946_v39 }
 0x1df   : >> { %v552_v40 = vpop.f32.mrf.mxu1 }
 0x1e0   : >> { %v638_v47 = vadd.f32 %v637_v41, %v552_v40 }
 0x1e1   : >> { %v949_v42 = vpop.f32.mrf.mxu1 }
 0x1e2   : >> { %v653_v51 = vadd.f32 %v959_v43, %v949_v42 }
 0x1e3   : >> { %v562_v44 = vpop.f32.mrf.mxu1 }
 0x1e4   : >> { %v648_v54 = vadd.f32 %v647_v49, %v562_v44 }
 0x1e5   : >> { %v966_v46 = vpop.f32.mrf.mxu1 }
 0x1e6   : >> { %v742_v48 = vadd.f32 %v966_v46, %v643_v45 }
 0x1e7   : >> { %v722_v50 = vpop.f32.mrf.mxu1 }
 0x1e8   : >> { %749 = vst.msk [vmem:[%s746_s7 + $0x8] sm:$0xff] %vm747_vm1, %v742_v48  ;;  %v741_v52 = vadd.f32 %v722_v50, %v638_v47 }
 0x1e9   : >> { %v969_v53 = vpop.f32.mrf.mxu1 }
 0x1ea   : >> { %748 = vst.msk [vmem:[%s746_s7] sm:$0xff] %vm747_vm1, %v741_v52  ;;  %v744_v55 = vadd.f32 %v969_v53, %v653_v51  ;;  %202 = sbr.rel (!%p200_p11) target bundleno = 56 (0x38), region = 86 }
 0x1eb   : >> { %v732_v56 = vpop.f32.mrf.mxu1 }
 0x1ec   : >> { %751 = vst.msk [vmem:[%s746_s7 + $0x18] sm:$0xff] %vm747_vm1, %v744_v55  ;;  %v743_v57 = vadd.f32 %v732_v56, %v648_v54 }
 0x1ee   : >> { %750 = vst.msk [vmem:[%s746_s7 + $0x10] sm:$0xff] %vm747_vm1, %v743_v57 }
 0x1ef   : > { %1069 = shalt.err (!%p1066_p0)
}
 0x1f0   : > { %s1070_s28 = scalar_lea.hbm %s1354_s20, 2048  ;;  %s1074_s9 = scalar_lea.hbm %s1403_s3, 4096 }
 0x1f1   : > { %p1071_p2 = scmp.ne.s32.totalorder %s1354_s20, %s1070_s28  ;;  %p1075_p3 = scmp.lt.s32.totalorder %s1354_s20, %s1403_s3 }
 0x1f2   : > { %p1076_p6 = scmp.lt.s32.totalorder %s1074_s9, %s1070_s28 }
 0x1f3   : > { %p1072_p9 = pnand %p1071_p2, %p1412_p13 }
 0x1f4   : > { %p1077_p11 = por %p1076_p6, %p1075_p3 }
 0x1f5   : > { %p1073_p1 = pneg %p1072_p9 }
 0x1f7   : > { %p1078_p12 = pnand %p1077_p11, %p1073_p1 }
 0x1f9   : > { %1081 = shalt.err (!%p1078_p12)
}
 0x1fa   : > { %s1134_s6 = smov 128   ;;  %s1135_s7 = smov 8  }
 0x1fb   : > { %972 = dma.vmem_to_hbm [thread:$0]  (%p1412_p13), %s1357_s22, 2048, %s1354_s20, %s753_s23, %s1134_s6, %s1134_s6, %s1135_s7  }
 0x1fc PF: > { %s782_s8 = sand.u32 1, %s1112_s12   ;;  %p1413_p4 = scmp.ne.s32.totalorder %s1409_s25, 0 }
 0x1fd   : > { %p1414_p5 = scmp.ge.s32.totalorder %s1124_s15, 2  ;;  %s783_s17 = scalar_lea.sflag [#allocation4], %s782_s8 }
 0x1ff   : > { %p979_p7 = pnand %p1414_p5, %p1413_p4 }
 0x201   : > { %p980_p8 = pneg %p979_p7 }
 0x203   : > { %1107 = dma.done.wait (%p980_p8), %s783_s17, 2048  }
 0x204   : > { %1109 = vsyncadd (%p980_p8), %s783_s17, 4294965248  ;;  %p16_p10 = scmp.ge.s32.totalorder %s1181_s18, 4   ;;  %s1415_s12 = smov %s1116_s13 }
 0x205   : > { %s1416_s13 = smov %s1120_s14  ;;  %s1417_s14 = smov %s1193_s21 }
 0x206   : > { %s1418_s15 = smov %s1181_s18  ;;  %18 = sbr.rel (!%p16_p10) target bundleno = 5 (0x5), region = 97 }
 0x20b   :  { %788 = vsyncpa [#allocation3], 1 }
 0x20c   :  { %790 = vsyncpa [#allocation3 + $0x1], 1 }
 0x20d   :  { %791 = vsyncpa [#allocation4], 1 }
 0x20e   :  { %793 = vsyncpa [#allocation4 + $0x1], 1 }

</bundles_post_ra>
